<compile_context>
chip_gen: v7x
topology: tpu7x:2x2x1
jax: 0.10.0
libtpu: 0.0.40
codegen_flags: <defaults>
</compile_context>

<pallas_src>
import jax
import jax.numpy as jnp
from jax.experimental import pallas as pl
from jax.experimental.pallas import tpu as pltpu

THRESH = 100.0 / 255.0

_MAX_LANE = 4096               # widest lane dim for a block (32 vregs per row)
_MAX_BLOCK_ELEMS = 256 * 1024  # ~1 MiB f32 input block; with 3x out + double
                               # buffering ~8 MiB -> fits v5e default scoped VMEM


def _threshold_bcast_kernel(x_ref, o_ref):
    # x_ref: (Bt, Rt, LANE) plane tile; o_ref: (3, Bt, Rt, LANE) = 3 copies.
    x = x_ref[...]
    y = jnp.where(x < THRESH, 0.0, x)            # weak scalars keep x.dtype
    o_ref[...] = jnp.broadcast_to(y, o_ref.shape)


def _plane_tiling(h, w):
    """Factor H*W into (rows, lane) with lane % 128 == 0 (lane-dense, unmasked
    stores), preferring sublane-aligned rows, then wider lanes.  Falls back to
    the raw (H, W) plane when H*W is not a multiple of 128."""
    hw = h * w
    if hw % 128 != 0:
        return h, w
    best_key, best = None, None
    lane = 128
    while lane <= min(hw, _MAX_LANE):
        if hw % lane == 0:
            rows = hw // lane
            key = (rows % 8 == 0, lane)          # sublane-dense first, then wide
            if best_key is None or key > best_key:
                best_key, best = key, (rows, lane)
        lane += 128
    return best


def extract_b_channel(img):
    img = jnp.asarray(img)
    if not jnp.issubdtype(img.dtype, jnp.floating):
        # torch.Tensor(...) / the anomalib pipeline feed float images; threshold
        # in float32 for non-float inputs rather than faking an integer compare.
        img = img.astype(jnp.float32)

    was_3d = img.ndim == 3
    x = img[None] if was_3d else img
    if x.ndim != 4:
        raise ValueError(f"expected 3-D or 4-D input, got shape {img.shape}")
    B, C, H, W = x.shape
    if C == 1:
        ch = 0        # torch repeats the single channel, so channel 2 == channel 0
    elif C >= 3:
        ch = 2
    else:
        # PyTorch would raise IndexError here; guard instead of an OOB DMA.
        raise ValueError(f"need channels == 1 or >= 3, got {C}")

    rows, lane = _plane_tiling(H, W)
    x_view = x.reshape(B, C, rows, lane)         # free reshape of trailing dims

    # Row-tile big planes; fuse batch planes when planes are small, so each grid
    # step moves a substantial, lane-dense block.
    max_rt = max(8, (_MAX_BLOCK_ELEMS // lane) // 8 * 8)
    if rows <= max_rt:
        rt = rows
        bt = max(1, min(B, _MAX_BLOCK_ELEMS // (rows * lane)))
    else:
        rt = max_rt                               # multiple of 8 by construction
        bt = 1
    n_b = pl.cdiv(B, bt)
    n_r = pl.cdiv(rows, rt)

    out = pl.pallas_call(
        _threshold_bcast_kernel,
        out_shape=jax.ShapeDtypeStruct((3, B, rows, lane), x.dtype),
        grid=(n_b, n_r),
        # Channel selection happens in the index_map (size-1 squeezed dim), so
        # only the B-channel plane is ever read from HBM.
        in_specs=[pl.BlockSpec((bt, None, rt, lane),
                               lambda b, r: (b, ch, r, 0))],
        # One output block carries all 3 copies -> the plane is read once and
        # replicated from VMEM.
        out_specs=pl.BlockSpec((3, bt, rt, lane),
                               lambda b, r: (0, b, r, 0)),
        compiler_params=pltpu.CompilerParams(
            dimension_semantics=("parallel", "parallel")),
    )(x_view)

    # torch: (B, H, W).repeat(1, 3, 1, 1) -> (1, 3*B, H, W); copies are tiled
    # along dim 1 in blocks of B, i.e. exactly a reshape of (3, B, H, W).
    out = out.reshape(1, 3 * B, H, W)
    if was_3d:
        out = out[0]   # squeeze(0); B == 1 here -> (3, H, W)
    return out


def _reference(img):
    # Pure-JAX reference mirroring the PyTorch code, for a sanity check.
    img = jnp.asarray(img)
    if not jnp.issubdtype(img.dtype, jnp.floating):
        img = img.astype(jnp.float32)
    was_3d = img.ndim == 3
    x = img[None] if was_3d else img
    B, C, H, W = x.shape
    if C == 1:
        x = jnp.tile(x, (1, 3, 1, 1))
    b = x[:, 2, :, :]
    b = jnp.where(b < THRESH, 0.0, b)
    out = jnp.tile(b[None], (1, 3, 1, 1)).reshape(1, 3 * B, H, W)
    if was_3d:
        out = out[0]
    return out


if __name__ == "__main__":
    key = jax.random.PRNGKey(0)

    # NCHW path (B=2, C=4, 16x16): H*W = 256 -> lane-dense (rows=1, lane=256)
    x = jax.random.uniform(key, (2, 4, 16, 16), dtype=jnp.float32)
    out = jax.block_until_ready(extract_b_channel(x))
    ref = _reference(x)
    assert out.shape == (1, 6, 16, 16), out.shape
    assert out.dtype == x.dtype, out.dtype
    assert jnp.allclose(out, ref), "mismatch vs reference (NCHW)"

    # CHW path (squeeze semantics)
    x3 = jax.random.uniform(jax.random.PRNGKey(1), (3, 16, 16), dtype=jnp.float32)
    out3 = jax.block_until_ready(extract_b_channel(x3))
    assert out3.shape == (3, 16, 16), out3.shape
    assert jnp.allclose(out3, _reference(x3)), "mismatch vs reference (CHW)"

    # single-channel path (channel 2 == channel 0 after torch.repeat)
    x1 = jax.random.uniform(jax.random.PRNGKey(2), (1, 1, 16, 16), dtype=jnp.float32)
    out1 = jax.block_until_ready(extract_b_channel(x1))
    assert out1.shape == (1, 3, 16, 16), out1.shape
    assert jnp.allclose(out1, _reference(x1)), "mismatch vs reference (C=1)"

    # odd spatial size -> fallback (H, W) full-plane blocks
    x_odd = jax.random.uniform(jax.random.PRNGKey(3), (1, 3, 8, 12), dtype=jnp.float32)
    out_odd = jax.block_until_ready(extract_b_channel(x_odd))
    assert out_odd.shape == (1, 3, 8, 12), out_odd.shape
    assert jnp.allclose(out_odd, _reference(x_odd)), "mismatch vs reference (odd HW)"

    print("KERNEL_OK")
</pallas_src>

<mosaic_0001>
module attributes {stable_mosaic.version = 11 : i64} {
  func.func @_threshold_bcast_kernel(%arg0: i32, %arg1: i32, %arg2: memref<2x1x1x256xf32, #tpu.memory_space<vmem>>, %arg3: memref<3x2x1x256xf32, #tpu.memory_space<vmem>>) attributes {dimension_semantics = [#tpu.dimension_semantics<parallel>, #tpu.dimension_semantics<parallel>], iteration_bounds = array<i64: 1, 1>, scalar_prefetch = 0 : i64, scratch_operands = 0 : i64, tpu.core_type = #tpu.core_type<tc>, window_params = [{transform_indices = @transform_0, window_bounds = array<i64: 2, 1, 1, 256>}, {transform_indices = @transform_1, window_bounds = array<i64: 3, 2, 1, 256>}]} {
    %c0 = arith.constant 0 : index
    %c0_0 = arith.constant 0 : index
    %c0_1 = arith.constant 0 : index
    %c0_2 = arith.constant 0 : index
    %0 = vector.load %arg2[%c0, %c0_0, %c0_1, %c0_2] : memref<2x1x1x256xf32, #tpu.memory_space<vmem>>, vector<2x1x1x256xf32>
    %1 = vector.shape_cast %0 : vector<2x1x1x256xf32> to vector<2x1x256xf32>
    %cst = arith.constant 0.392156869 : f32
    %2 = vector.broadcast %cst : f32 to vector<2x1x256xf32>
    %3 = arith.cmpf olt, %1, %2 : vector<2x1x256xf32>
    %cst_3 = arith.constant 0.000000e+00 : f32
    %4 = vector.broadcast %cst_3 : f32 to vector<2x1x256xf32>
    %5 = arith.select %3, %4, %1 : vector<2x1x256xi1>, vector<2x1x256xf32>
    %6 = vector.shape_cast %5 : vector<2x1x256xf32> to vector<1x2x1x256xf32>
    %7 = vector.broadcast %6 : vector<1x2x1x256xf32> to vector<3x2x1x256xf32>
    %c0_4 = arith.constant 0 : index
    %c0_5 = arith.constant 0 : index
    %c0_6 = arith.constant 0 : index
    %c0_7 = arith.constant 0 : index
    %8 = vector.load %arg3[%c0_4, %c0_5, %c0_6, %c0_7] : memref<3x2x1x256xf32, #tpu.memory_space<vmem>>, vector<3x2x1x256xf32>
    tpu.vector_store %arg3[%c0_4, %c0_5, %c0_6, %c0_7], %7 {strides = array<i32>} : memref<3x2x1x256xf32, #tpu.memory_space<vmem>>, vector<3x2x1x256xf32>,
    return
  }
  func.func @transform_0(%arg0: i32, %arg1: i32) -> (i32, i32, i32, i32) {
    %c2_i32 = arith.constant 2 : i32
    %c0_i32 = arith.constant 0 : i32
    %c0_i32_0 = arith.constant 0 : i32
    return %arg0, %c2_i32, %arg1, %c0_i32 : i32, i32, i32, i32
  }
  func.func @transform_1(%arg0: i32, %arg1: i32) -> (i32, i32, i32, i32) {
    %c0_i32 = arith.constant 0 : i32
    %c0_i32_0 = arith.constant 0 : i32
    %c0_i32_1 = arith.constant 0 : i32
    return %c0_i32, %arg0, %arg1, %c0_i32_0 : i32, i32, i32, i32
  }
}

</mosaic_0001>

<bundles_post_ra>
// kernel: tpu_custom_call.1
= control target key start
LH: loop header
LB: loop body
LE: loop exit
PB: predicated region body
PF: predicated region fallthrough
CT: control target
= control target key end

     0   :  { %6 = vsyncpa [#allocation3], 0  ;;  %s157_s0 = inlined_call_operand.hbm [shape: f32[2,4,1,256], index: 0, kind: input, shape index: {}]   ;;  %s158_s1 = inlined_call_operand.hbm [shape: f32[3,2,1,256], index: 1, kind: output, shape index: {}]  }
   0x1   :  { %7 = vsyncpa [#allocation4], 0  ;;  %s13_s8 = scalar_lea.hbm %s157_s0, 64  ;;  %s113_s9 = smov [#allocation2]  }
   0x2   :  { %s14_s10 = sshll.u32 %s113_s9, 4  ;;  %s86_s13 = scalar_lea.hbm %s157_s0, 128  ;;  %s15_s10 = int_to_ptr.vmem [resolvable:$true] %s14_s10 }
   0x3   :  { %p63_p0 = scmp.ne.s32.totalorder %s13_s8, %s86_s13  ;;  %s64_s16 = scalar_lea.hbm %s157_s0, 256 }
   0x4   :  { %p65_p1 = scmp.lt.u32.totalorder %s13_s8, %s157_s0  ;;  %p66_p2 = scmp.lt.u32.totalorder %s64_s16, %s86_s13 }
   0x5   :  { %p68_p4 = scmp.lt.u32.totalorder %s86_s13, %s13_s8 }
   0x6   :  { %p67_p3 = por %p66_p2, %p65_p1 }
   0x8   :  { %p69_p5 = por %p68_p4, %p67_p3 }
   0xa   :  { %p70_p6 = pnand %p69_p5, %p63_p0 }
   0xc   :  { %73 = shalt.err (!%p70_p6)
}
   0xd   :  { %s74_s19 = scalar_lea.vmem %s15_s10, 64  ;;  %p79_p8 = scmp.lt.s32.totalorder %s15_s10, %s15_s10 }
   0xe   :  { %p75_p7 = scmp.ne.s32.totalorder %s15_s10, %s74_s19  ;;  %p80_p9 = scmp.lt.s32.totalorder %s74_s19, %s74_s19 }
  0x10   :  { %p81_p10 = por %p80_p9, %p79_p8 }
  0x12   :  { %p82_p11 = pnand %p81_p10, %p75_p7 }
  0x14   :  { %85 = shalt.err (!%p82_p11)
}
  0x15   :  { %s114_s20 = smov 128   ;;  %s115_s21 = smov 32  }
  0x16   :  { %s116_s22 = smov 2  }
  0x17   :  { %20 = dma.hbm_to_vmem [thread:$0]  %s13_s8, 64, %s15_s10, [#allocation3], %s114_s20, %s115_s21, %s116_s22  }
  0x18   :  { %109 = dma.done.wait [#allocation3], 64  }
  0x19   :  { %110 = vsyncadd [#allocation3], 4294967232  ;;  %v30_v0 = vlaneseq  ;;  %s117_s0 = smov [#allocation5]   ;;  %v24_v1 = vld [vmem:[#allocation2] sm:$0x3] }
  0x1a   :  { %s45_s23 = sshll.u32 %s117_s0, 4  ;;  %v25_v2 = vld [vmem:[#allocation2 + $0x2] sm:$0x3]  ;;  %vm26_vm1 = vcmp.lt.f32.partialorder %v24_v1, 0.39215687  ;;  %s46_s23 = int_to_ptr.vmem [resolvable:$true] %s45_s23 }
  0x1b   :  { %vm32_vm0 = vcmp.lt.s32.totalorder %v30_v0, 256  ;;  %vm27_vm2 = vcmp.lt.f32.partialorder %v25_v2, 0.39215687  ;;  %v28_v3 = vsel %vm26_vm1, 0.0, %v24_v1  ;;  %s87_s24 = scalar_lea.vmem %s46_s23, 192  ;;  %p92_p13 = scmp.lt.s32.totalorder %s46_s23, %s46_s23 }
  0x1c   :  { %v29_v4 = vsel %vm27_vm2, 0.0, %v25_v2  ;;  %34 = vst.msk [vmem:[#allocation5] sm:$0x3] %vm32_vm0, %v28_v3  ;;  %36 = vst.msk [vmem:[#allocation5 + $0x4] sm:$0x3] %vm32_vm0, %v28_v3  ;;  %p88_p12 = scmp.ne.s32.totalorder %s46_s23, %s87_s24  ;;  %p93_p0 = scmp.lt.s32.totalorder %s87_s24, %s87_s24 }
  0x1d   :  { %38 = vst.msk [vmem:[#allocation5 + $0x8] sm:$0x3] %vm32_vm0, %v28_v3  ;;  %35 = vst.msk [vmem:[#allocation5 + $0x2] sm:$0x3] %vm32_vm0, %v29_v4 }
  0x1e   :  { %37 = vst.msk [vmem:[#allocation5 + $0x6] sm:$0x3] %vm32_vm0, %v29_v4  ;;  %39 = vst.msk [vmem:[#allocation5 + $0xa] sm:$0x3] %vm32_vm0, %v29_v4  ;;  %p94_p1 = por %p93_p0, %p92_p13 }
  0x20   :  { %p95_p2 = pnand %p94_p1, %p88_p12 }
  0x22   :  { %98 = shalt.err (!%p95_p2)
}
  0x23   :  { %s99_s27 = scalar_lea.hbm %s158_s1, 192 }
  0x24   :  { %p100_p3 = scmp.ne.s32.totalorder %s158_s1, %s99_s27  ;;  %p103_p4 = scmp.lt.u32.totalorder %s99_s27, %s158_s1 }
  0x26   :  { %p105_p5 = pnand %p103_p4, %p100_p3 }
  0x28   :  { %108 = shalt.err (!%p105_p5)
}
  0x29   :  { %51 = dma.vmem_to_hbm [thread:$0]  %s46_s23, 192, %s158_s1, [#allocation4], %s115_s21, %s115_s21, %s116_s22  }
  0x2a   :  { %111 = dma.done.wait [#allocation4], 192  }
  0x2b   :  { %112 = vsyncadd [#allocation4], 4294967104 }
  0x2c   :  { %55 = vsyncpa [#allocation3], 1 }
  0x2d   :  { %56 = vsyncpa [#allocation4], 1 }

</bundles_post_ra>
